<compile_context>
chip_gen: v6e
topology: v6e:2x2x1
jax: 0.10.0
libtpu: 0.0.40
codegen_flags: <defaults>
</compile_context>

<pallas_src>
import functools

import jax
import jax.numpy as jnp
from jax.experimental import pallas as pl
from jax.experimental.pallas import tpu as pltpu


def _cdiv(a, b):
    return (a + b - 1) // b


def _round_up(a, b):
    return _cdiv(a, b) * b


def _vmem_capacity_bytes():
    """Physical VMEM per TensorCore; falls back to 128 MiB if the query is unavailable."""
    try:
        return int(pltpu.get_tpu_info().vmem_capacity_bytes)
    except Exception:  # noqa: BLE001 - any failure => conservative default
        return 128 * 1024 * 1024


def _linear_block_kernel(x_ref, w_ref, bias_ref, o_ref, *, nb, unroll_k):
    # x_ref:    (nb, Cin, TM)   input tile (spatial = lanes)
    # w_ref:    (Cout, Cin)     conv weight with BN scale pre-folded
    # bias_ref: (Cout, 1)       folded BN bias (f32)
    # o_ref:    (nb, Cout, TM)  output tile (spatial = lanes)
    w = w_ref[...]
    bias = bias_ref[...]                      # (Cout, 1) f32
    cout, cin = w.shape
    tm = x_ref.shape[-1]

    if unroll_k:
        # Degenerate-K matmul: unrolled VPU FMA (lane/sublane broadcasts), no MXU push /
        # result-FIFO drain. Upcast to f32 in-register (v5e VPU has no bf16).
        w32 = w.astype(jnp.float32)
        bias_b = jnp.broadcast_to(bias, (cout, tm))   # hoisted out of the loops
        for bi in range(nb):                          # nb is static (block shape)
            x32 = x_ref[bi].astype(jnp.float32)       # (Cin, TM)
            acc = bias_b
            for k in range(cin):                      # static unroll; cin is tiny
                acc = acc + w32[:, k:k + 1] * x32[k:k + 1, :]
            o_ref[bi] = acc.astype(o_ref.dtype)
    else:
        for bi in range(nb):                          # nb is static (block shape)
            acc = jnp.dot(w, x_ref[bi], preferred_element_type=jnp.float32)
            o_ref[bi] = (acc + bias).astype(o_ref.dtype)


@functools.partial(jax.jit, static_argnames=("eps",))
def linear_block_forward(x_nchw, conv_w, gamma, beta, running_mean, running_var, eps=1e-5):
    """Forward pass of Linear_block (1x1 conv, no bias, + eval-mode BatchNorm2d).

    x_nchw : (N, Cin, H, W) float32 or bfloat16
    conv_w : (Cout, Cin, 1, 1)      (PyTorch Conv2d weight layout)
    gamma, beta, running_mean, running_var : (Cout,)
    Returns (N, Cout, H, W) in x's dtype.
    """
    n, cin, h, w = x_nchw.shape
    cout = conv_w.shape[0]
    hw = h * w
    io_dtype = x_nchw.dtype
    bpe = jnp.dtype(io_dtype).itemsize

    # ---- Fold BN (eval mode) in f32; cast weight to the I/O dtype afterwards. ----
    f32 = jnp.float32
    scale = gamma.astype(f32) * jax.lax.rsqrt(running_var.astype(f32) + eps)      # (Cout,)
    w_mat = (conv_w.reshape(cout, cin).astype(f32) * scale[:, None]).astype(io_dtype)
    bias2d = (beta.astype(f32) - running_mean.astype(f32) * scale).reshape(cout, 1)  # f32

    # Native NCHW — pure reshape, no transpose.
    x3 = x_nchw.reshape(n, cin, hw)

    # Lane-dense stores: pad tiny spatial extents up to one full vreg row of lanes.
    hw_p = hw
    if hw < 128:
        hw_p = 128
        x3 = jnp.pad(x3, ((0, 0), (0, 0), (0, hw_p - hw)))

    # ---- Tiling: target ~4 MiB of x+y tile bytes per grid step, within VMEM budget. ----
    vmem_cap = _vmem_capacity_bytes()
    vmem_budget = int(vmem_cap * 0.8)                 # headroom for compiler scratch
    weight_bytes = cout * cin * bpe + cout * 4
    per_lane = (cin + cout) * bpe                     # x + y bytes per spatial element
    target_step_bytes = 4 << 20
    max_tile_bytes = max((vmem_budget - 4 * weight_bytes) // 2, per_lane * 128)
    tile_budget = min(target_step_bytes, max_tile_bytes)
    desired_tm = max(tile_budget // per_lane, 128)

    if hw_p <= desired_tm:
        # Whole spatial extent per step; pack several batch images to hit the byte target.
        tm_eff = hw_p
        num_m = 1
        nb = max(1, tile_budget // max(per_lane * hw_p, 1))
        nb = min(nb, n, 64)
        if n >= 2:
            nb = min(nb, _cdiv(n, 2))   # keep >= 2 batch grid steps (v7x megacore, pipelining)
    else:
        # Split the spatial axis; keep TM a multiple of 256 (MXU cadence), min 128.
        tm_eff = (desired_tm // 256) * 256
        if tm_eff == 0:
            tm_eff = max((desired_tm // 128) * 128, 128)
        num_m = _cdiv(hw_p, tm_eff)
        nb = 1

    grid_b = _cdiv(n, nb)
    # v7x has 2 TensorCores: avoid a single-step grid when it can be split.
    if grid_b * num_m < 2 and num_m == 1 and tm_eff >= 256:
        tm_eff = _round_up(_cdiv(hw_p, 2), 128)
        num_m = _cdiv(hw_p, tm_eff)

    grid = (grid_b, num_m)

    needed_bytes = 2 * nb * per_lane * tm_eff + 4 * weight_bytes + (1 << 20)
    vmem_limit = int(min(vmem_budget, max(needed_bytes, 16 * 1024 * 1024)))

    kernel = functools.partial(_linear_block_kernel, nb=nb, unroll_k=(cin <= 8))

    y3 = pl.pallas_call(
        kernel,
        out_shape=jax.ShapeDtypeStruct((n, cout, hw_p), io_dtype),
        grid_spec=pltpu.PrefetchScalarGridSpec(
            num_scalar_prefetch=0,
            grid=grid,
            in_specs=[
                pl.BlockSpec((nb, cin, tm_eff), lambda b, i: (b, 0, i)),
                pl.BlockSpec((cout, cin), lambda b, i: (0, 0)),
                pl.BlockSpec((cout, 1), lambda b, i: (0, 0)),
            ],
            out_specs=pl.BlockSpec((nb, cout, tm_eff), lambda b, i: (b, 0, i)),
        ),
        compiler_params=pltpu.CompilerParams(
            dimension_semantics=("parallel", "parallel"),
            vmem_limit_bytes=vmem_limit),
    )(x3, w_mat, bias2d)

    if hw_p != hw:
        y3 = y3[:, :, :hw]
    return y3.reshape(n, cout, h, w)


def _reference(x_nchw, conv_w, gamma, beta, running_mean, running_var, eps=1e-5):
    """Pure-JAX reference (1x1 conv + eval-mode BN), computed in NCHW."""
    cout, cin = conv_w.shape[0], conv_w.shape[1]
    w_mat = conv_w.reshape(cout, cin)
    y = jnp.einsum("oc,nchw->nohw", w_mat, x_nchw)
    scale = gamma / jnp.sqrt(running_var + eps)
    bias = beta - running_mean * scale
    return y * scale[None, :, None, None] + bias[None, :, None, None]


if __name__ == "__main__":
    key = jax.random.PRNGKey(0)
    k_x, k_w, k_g, k_b, k_m, k_v = jax.random.split(key, 6)

    # Small shapes consistent with the module: batch=2, in_c=4, out_c=8, spatial=16x16.
    N, Cin, Cout, H, W = 2, 4, 8, 16, 16

    x = jax.random.normal(k_x, (N, Cin, H, W), dtype=jnp.float32)
    conv_w = jax.random.normal(k_w, (Cout, Cin, 1, 1), dtype=jnp.float32) * 0.1
    gamma = jax.random.normal(k_g, (Cout,), dtype=jnp.float32) * 0.1 + 1.0
    beta = jax.random.normal(k_b, (Cout,), dtype=jnp.float32) * 0.1
    running_mean = jax.random.normal(k_m, (Cout,), dtype=jnp.float32) * 0.1
    running_var = jax.random.uniform(k_v, (Cout,), dtype=jnp.float32,
                                     minval=0.5, maxval=1.5)

    out = linear_block_forward(x, conv_w, gamma, beta, running_mean, running_var)
    out = jax.block_until_ready(out)

    ref = _reference(x, conv_w, gamma, beta, running_mean, running_var)
    assert out.shape == (N, Cout, H, W), out.shape
    assert jnp.allclose(out, ref, atol=1e-4, rtol=1e-4), float(jnp.max(jnp.abs(out - ref)))

    print("KERNEL_OK")
</pallas_src>

<mosaic_0001>
module attributes {stable_mosaic.version = 11 : i64} {
  func.func @_linear_block_kernel(%arg0: i32, %arg1: i32, %arg2: memref<1x4x256xf32, #tpu.memory_space<vmem>>, %arg3: memref<8x4xf32, #tpu.memory_space<vmem>>, %arg4: memref<8x1xf32, #tpu.memory_space<vmem>>, %arg5: memref<1x8x256xf32, #tpu.memory_space<vmem>>) attributes {dimension_semantics = [#tpu.dimension_semantics<parallel>, #tpu.dimension_semantics<parallel>], iteration_bounds = array<i64: 2, 1>, scalar_prefetch = 0 : i64, scratch_operands = 0 : i64, tpu.core_type = #tpu.core_type<tc>, window_params = [{transform_indices = @transform_0, window_bounds = array<i64: 1, 4, 256>}, {pipeline_mode = #tpu.pipeline_mode<synchronous>, transform_indices = @transform_1, window_bounds = array<i64: 8, 4>}, {pipeline_mode = #tpu.pipeline_mode<synchronous>, transform_indices = @transform_2, window_bounds = array<i64: 8, 1>}, {transform_indices = @transform_3, window_bounds = array<i64: 1, 8, 256>}]} {
    %c0 = arith.constant 0 : index
    %c0_0 = arith.constant 0 : index
    %0 = vector.load %arg3[%c0, %c0_0] : memref<8x4xf32, #tpu.memory_space<vmem>>, vector<8x4xf32>
    %c0_1 = arith.constant 0 : index
    %c0_2 = arith.constant 0 : index
    %1 = vector.load %arg4[%c0_1, %c0_2] : memref<8x1xf32, #tpu.memory_space<vmem>>, vector<8x1xf32>
    %2 = vector.shape_cast %1 : vector<8x1xf32> to vector<8x1xf32>
    %3 = vector.broadcast %2 : vector<8x1xf32> to vector<8x256xf32>
    %c0_3 = arith.constant 0 : index
    %c0_4 = arith.constant 0 : index
    %c0_5 = arith.constant 0 : index
    %4 = vector.load %arg2[%c0_3, %c0_4, %c0_5] : memref<1x4x256xf32, #tpu.memory_space<vmem>>, vector<1x4x256xf32>
    %5 = vector.shape_cast %4 : vector<1x4x256xf32> to vector<4x256xf32>
    %6 = vector.extract_strided_slice %0 {offsets = [0, 0], sizes = [8, 1], strides = [1, 1]} : vector<8x4xf32> to vector<8x1xf32>
    %7 = vector.extract_strided_slice %5 {offsets = [0, 0], sizes = [1, 256], strides = [1, 1]} : vector<4x256xf32> to vector<1x256xf32>
    %8 = vector.broadcast %6 : vector<8x1xf32> to vector<8x256xf32>
    %9 = vector.broadcast %7 : vector<1x256xf32> to vector<8x256xf32>
    %10 = arith.mulf %8, %9 : vector<8x256xf32>
    %11 = arith.addf %3, %10 : vector<8x256xf32>
    %12 = vector.extract_strided_slice %0 {offsets = [0, 1], sizes = [8, 1], strides = [1, 1]} : vector<8x4xf32> to vector<8x1xf32>
    %13 = vector.extract_strided_slice %5 {offsets = [1, 0], sizes = [1, 256], strides = [1, 1]} : vector<4x256xf32> to vector<1x256xf32>
    %14 = vector.broadcast %12 : vector<8x1xf32> to vector<8x256xf32>
    %15 = vector.broadcast %13 : vector<1x256xf32> to vector<8x256xf32>
    %16 = arith.mulf %14, %15 : vector<8x256xf32>
    %17 = arith.addf %11, %16 : vector<8x256xf32>
    %18 = vector.extract_strided_slice %0 {offsets = [0, 2], sizes = [8, 1], strides = [1, 1]} : vector<8x4xf32> to vector<8x1xf32>
    %19 = vector.extract_strided_slice %5 {offsets = [2, 0], sizes = [1, 256], strides = [1, 1]} : vector<4x256xf32> to vector<1x256xf32>
    %20 = vector.broadcast %18 : vector<8x1xf32> to vector<8x256xf32>
    %21 = vector.broadcast %19 : vector<1x256xf32> to vector<8x256xf32>
    %22 = arith.mulf %20, %21 : vector<8x256xf32>
    %23 = arith.addf %17, %22 : vector<8x256xf32>
    %24 = vector.extract_strided_slice %0 {offsets = [0, 3], sizes = [8, 1], strides = [1, 1]} : vector<8x4xf32> to vector<8x1xf32>
    %25 = vector.extract_strided_slice %5 {offsets = [3, 0], sizes = [1, 256], strides = [1, 1]} : vector<4x256xf32> to vector<1x256xf32>
    %26 = vector.broadcast %24 : vector<8x1xf32> to vector<8x256xf32>
    %27 = vector.broadcast %25 : vector<1x256xf32> to vector<8x256xf32>
    %28 = arith.mulf %26, %27 : vector<8x256xf32>
    %29 = arith.addf %23, %28 : vector<8x256xf32>
    %c0_6 = arith.constant 0 : index
    %c0_7 = arith.constant 0 : index
    %c0_8 = arith.constant 0 : index
    %30 = vector.load %arg5[%c0_6, %c0_7, %c0_8] : memref<1x8x256xf32, #tpu.memory_space<vmem>>, vector<1x8x256xf32>
    %31 = vector.shape_cast %30 : vector<1x8x256xf32> to vector<8x256xf32>
    %32 = vector.shape_cast %29 : vector<8x256xf32> to vector<1x8x256xf32>
    tpu.vector_store %arg5[%c0_6, %c0_7, %c0_8], %32 {strides = array<i32>} : memref<1x8x256xf32, #tpu.memory_space<vmem>>, vector<1x8x256xf32>,
    return
  }
  func.func @transform_0(%arg0: i32, %arg1: i32) -> (i32, i32, i32) {
    %c0_i32 = arith.constant 0 : i32
    %c0_i32_0 = arith.constant 0 : i32
    return %arg0, %c0_i32, %arg1 : i32, i32, i32
  }
  func.func @transform_1(%arg0: i32, %arg1: i32) -> (i32, i32) {
    %c0_i32 = arith.constant 0 : i32
    %c0_i32_0 = arith.constant 0 : i32
    %c0_i32_1 = arith.constant 0 : i32
    return %c0_i32, %c0_i32_0 : i32, i32
  }
  func.func @transform_2(%arg0: i32, %arg1: i32) -> (i32, i32) {
    %c0_i32 = arith.constant 0 : i32
    %c0_i32_0 = arith.constant 0 : i32
    %c0_i32_1 = arith.constant 0 : i32
    return %c0_i32, %c0_i32_0 : i32, i32
  }
  func.func @transform_3(%arg0: i32, %arg1: i32) -> (i32, i32, i32) {
    %c0_i32 = arith.constant 0 : i32
    %c0_i32_0 = arith.constant 0 : i32
    return %arg0, %c0_i32, %arg1 : i32, i32, i32
  }
}

</mosaic_0001>

<bundles_post_ra>
// kernel: linear_block_forward.1
= control target key start
LH: loop header
LB: loop body
LE: loop exit
PB: predicated region body
PF: predicated region fallthrough
CT: control target
= control target key end

     0   :  { %s506_s12 = smov 0   ;;  %s508_s13 = smov 0   ;;  %s549_s0 = inlined_call_operand.vmem [shape: f32[2,4,256], index: 0, kind: input, shape index: {}]   ;;  %s550_s1 = inlined_call_operand.vmem [shape: f32[8,4], index: 1, kind: input, shape index: {}]   ;;  %s551_s2 = inlined_call_operand.vmem [shape: f32[8,1], index: 2, kind: input, shape index: {}]   ;;  %s552_s3 = inlined_call_operand.vmem [shape: f32[2,8,256], index: 3, kind: output, shape index: {}]  }
   0x1   :  { %s510_s14 = smov 0  }
   0x2 LB: > { %s25_s15 = sadd.s32 1, %s476_s13  ;;  %p417_p0 = scmp.ge.s32.totalorder %s480_s14, 1  ;;  %s480_s14 = sphi %s510_s14, %s13_s14   ;;  %s476_s13 = sphi %s508_s13, %s554_s13   ;;  %s472_s12 = sphi %s506_s12, %s553_s12  }
   0x3   : > { %p27_p1 = scmp.ge.s32.totalorder %s25_s15, 2  ;;  %p158_p2 = scmp.lt.s32.totalorder %s480_s14, 3 }
   0x5   : > { %s556_s15 = smov (%p27_p1, %s25_s15), 0  ;;  %p159_p3 = pnand %p417_p0, %p158_p2 }
   0x6   : > { %p191_p4 = scmp.lt.s32.totalorder (!%p159_p3), %s472_s12, 1 }
   0x7   : > { %162 = sbr.rel (%p159_p3) target bundleno = 152 (0x98), region = 32 }
   0xc   : > { %v210_v0 = vld [vmem:[%s550_s1] sm:$0xff]  ;;  %v482_v1 = vmov 0   ;;  %v483_v2 = vmov 1   ;;  %v484_v4 = vmov 2   ;;  %v485_v5 = vmov 3   ;;  %s558_s12 = smov (!%p191_p4, %s472_s12), 1 }
   0xd   : > { %454 = vset.pattern.permute.xlu0 %v482_v1  ;;  %455 = vset.pattern.permute.xlu1 %v483_v2  ;;  %v211_v3 = vld [vmem:[%s551_s2] sm:$0xff]  ;;  %v224_v6 = vlaneseq  ;;  %s424_s20 = sshll.u32 %s558_s12, 3  ;;  %s425_s24 = sshll.u32 %s558_s12, 4 }
   0xe   : > { %220 = vperm.xlu0 %454, %v210_v0   ;;  %247 = vperm.xlu1 %455, %v210_v0   ;;  %s198_s23 = scalar_lea.vmem %s549_s0, %s424_s20  ;;  %s208_s27 = scalar_lea.vmem %s552_s3, %s425_s24 }
   0xf   : > { %v225_v7 = vshrl.u32 %v224_v6, 7  ;;  %v217_v10 = vld [vmem:[%s198_s23] sm:$0xff] }
  0x11   : > { %v226_v8 = vsub.s32 0, %v225_v7  ;;  %v230_v9 = vsub.s32 4, %v225_v7  ;;  %v252_v11 = vsub.s32 1, %v225_v7  ;;  %v256_v12 = vsub.s32 5, %v225_v7 }
  0x12   : > { %214 = vperm.xlu0 %454, %v211_v3   ;;  %456 = vset.pattern.permute.xlu1 %v484_v4  ;;  %v278_v13 = vsub.s32 2, %v225_v7  ;;  %v282_v14 = vsub.s32 6, %v225_v7  ;;  %v304_v21 = vsub.s32 3, %v225_v7  ;;  %v308_v22 = vsub.s32 7, %v225_v7 }
  0x13   : > { %273 = vperm.xlu1 %456, %v210_v0   ;;  %v227_v15 = vrot.slane %v217_v10, %v226_v8  ;;  %v231_v16 = vrot.slane %v217_v10, %v230_v9  ;;  %v253_v17 = vrot.slane %v217_v10, %v252_v11  ;;  %v257_v18 = vrot.slane %v217_v10, %v256_v12 }
  0x14   : > { %v279_v19 = vrot.slane %v217_v10, %v278_v13  ;;  %v283_v20 = vrot.slane %v217_v10, %v282_v14  ;;  %v305_v31 = vrot.slane %v217_v10, %v304_v21  ;;  %v309_v32 = vrot.slane %v217_v10, %v308_v22 }
  0x15   : > { %v237_v23 = vrot.slane %v227_v15, %v226_v8  ;;  %v241_v24 = vrot.slane %v231_v16, %v226_v8  ;;  %v263_v27 = vrot.slane %v253_v17, %v252_v11  ;;  %v267_v28 = vrot.slane %v257_v18, %v252_v11 }
  0x16   : > { %457 = vset.pattern.permute.xlu0 %v485_v5  ;;  %v289_v29 = vrot.slane %v279_v19, %v278_v13  ;;  %v293_v30 = vrot.slane %v283_v20, %v278_v13  ;;  %v315_v43 = vrot.slane %v305_v31, %v304_v21  ;;  %v319_v44 = vrot.slane %v309_v32, %v304_v21 }
  0x17   : > { %299 = vperm.xlu0 %457, %v210_v0  }
  0x89   : > { %v221_v25 = vpop.permute.xlu0 %220  ;;  %v248_v26 = vpop.permute.xlu1 %247 }
  0x8a   : > { %v242_v33 = vmul.f32 %v237_v23, %v221_v25  ;;  %v243_v34 = vmul.f32 %v241_v24, %v221_v25  ;;  %v268_v36 = vmul.f32 %v263_v27, %v248_v26  ;;  %v269_v37 = vmul.f32 %v267_v28, %v248_v26 }
  0x8d   : > { %v215_v35 = vpop.permute.xlu0 %214 }
  0x8e   : > { %v244_v38 = vadd.f32 %v242_v33, %v215_v35  ;;  %v245_v39 = vadd.f32 %v243_v34, %v215_v35  ;;  %v274_v40 = vpop.permute.xlu1 %273 }
  0x8f   : > { %v294_v41 = vmul.f32 %v289_v29, %v274_v40  ;;  %v295_v42 = vmul.f32 %v293_v30, %v274_v40 }
  0x90   : > { %v270_v45 = vadd.f32 %v268_v36, %v244_v38  ;;  %v271_v46 = vadd.f32 %v269_v37, %v245_v39 }
  0x92   : > { %v296_v47 = vadd.f32 %v294_v41, %v270_v45  ;;  %v297_v48 = vadd.f32 %v295_v42, %v271_v46  ;;  %v300_v49 = vpop.permute.xlu0 %299 }
  0x93   : > { %v320_v50 = vmul.f32 %v315_v43, %v300_v49  ;;  %v321_v51 = vmul.f32 %v319_v44, %v300_v49 }
  0x95   : > { %v322_v52 = vadd.f32 %v320_v50, %v296_v47  ;;  %v323_v53 = vadd.f32 %v321_v51, %v297_v48 }
  0x97   : > { %324 = vst [vmem:[%s208_s27] sm:$0xff] %v322_v52  ;;  %325 = vst [vmem:[%s208_s27 + $0x8] sm:$0xff] %v323_v53 }
  0x98 PF: > { %s13_s14 = sadd.s32 1, %s480_s14   ;;  %s553_s12 = smov %s476_s13 }
  0x99   : > { %p10_p5 = scmp.ge.s32.totalorder %s13_s14, 4   ;;  %s554_s13 = smov %s556_s15 }
  0x9b   :  { %12 = sbr.rel (!%p10_p5) target bundleno = 2 (0x2), region = 62 }

</bundles_post_ra>
